<compile_context>
chip_gen: v7x
topology: tpu7x:2x2x1
jax: 0.10.0
libtpu: 0.0.40
codegen_flags: <defaults>
</compile_context>

<pallas_src>
import functools

import jax
import jax.numpy as jnp
from jax import lax
from jax.experimental import pallas as pl
from jax.experimental.pallas import tpu as pltpu


def _elastic_arcface_kernel(x_ref, lab_ref, cosm_ref, sinm_ref, out_ref,
                            m_scr, l_scr, t_scr, *, s, c_tile):
    ci = pl.program_id(1)
    nc = pl.num_programs(1)
    eps = 1e-7

    @pl.when(ci == 0)
    def _():
        m_scr[...] = jnp.full_like(m_scr, -jnp.inf)
        l_scr[...] = jnp.zeros_like(l_scr)
        t_scr[...] = jnp.zeros_like(t_scr)

    # Upcast in-kernel (bf16 inputs stay bf16 in HBM), then clamp in f32.
    x = jnp.clip(x_ref[...].astype(jnp.float32), -1.0 + eps, 1.0 - eps)  # (Bt, Ct)
    bt, ct = x.shape
    z = x * s                                   # plain scaled logits

    lab = lab_ref[...]                          # (Bt, 1) int32; -1 = ignore
    col = ci * c_tile + lax.broadcasted_iota(jnp.int32, (bt, ct), 1)
    onehot = col == lab                         # all-False for ignore rows

    # Gather the target cosine (exactly one C tile contains it per valid row).
    t_scr[...] += jnp.sum(jnp.where(onehot, x, 0.0), axis=-1, keepdims=True)

    # Online logsumexp over the *plain* scaled logits (no full-tile margin math).
    m_new = jnp.maximum(m_scr[...], jnp.max(z, axis=-1, keepdims=True))
    l_scr[...] = (l_scr[...] * jnp.exp(m_scr[...] - m_new)
                  + jnp.sum(jnp.exp(z - m_new), axis=-1, keepdims=True))
    m_scr[...] = m_new

    @pl.when(ci == nc - 1)
    def _():
        valid = lab != -1                       # (Bt, 1)
        x_t = t_scr[...]                        # target cosine (0 for ignore rows)
        cos_m = cosm_ref[...]
        sin_m = sinm_ref[...]
        # cos(acos(x_t) + m) = x_t*cos(m) - sqrt(1 - x_t^2)*sin(m)  -- (Bt,1) only
        shifted_t = x_t * cos_m - jnp.sqrt(jnp.maximum(1.0 - x_t * x_t, 0.0)) * sin_m
        z_t = x_t * s
        zs_t = shifted_t * s
        m_i = m_scr[...]
        # Swap the target term in the sum-exp (same rowmax => stable for s=30).
        corr = jnp.where(valid, jnp.exp(zs_t - m_i) - jnp.exp(z_t - m_i), 0.0)
        lse = m_i + jnp.log(l_scr[...] + corr)
        per_row = jnp.where(valid, lse - zs_t, 0.0)
        out_ref[...] = per_row


def _pick_tile(dim, target, align):
    """Largest multiple of `align` that divides `dim` and is <= target, else full dim."""
    if dim <= target:
        return dim
    t = (target // align) * align
    cand = t
    while cand >= align:
        if dim % cand == 0:
            return cand
        cand -= align
    return dim


def elastic_arcface_loss(cos_theta, label, key, *, s=30.0, m=0.5, std=0.0125,
                         b_tile=None, c_tile=None):
    """JAX/Pallas equivalent of ElasticArcFaceLoss.forward.

    cos_theta: (B, C) float32/bfloat16 cosine similarities.
    label:     (B,)   int class ids, -1 = ignore.
    key:       PRNG key for the elastic (random) margin draw.
    """
    B, C = cos_theta.shape

    # Generation-friendly default tiles: 2 x (256 x 2048 x 4B) = 4 MiB of input
    # double-buffer -> fits the default scoped VMEM on v5e/v6e and v7x (64 MiB).
    bt = b_tile if b_tile is not None else _pick_tile(B, 256, 8)
    ct = c_tile if c_tile is not None else _pick_tile(C, 2048, 128)
    nb, nc = B // bt, C // ct

    # Elastic margin ~ N(m, std) per sample (deterministic via `key`).
    margin = m + std * jax.random.normal(key, (B, 1), dtype=jnp.float32)
    cos_m = jnp.cos(margin)
    sin_m = jnp.sin(margin)
    lab = label.astype(jnp.int32).reshape(B, 1)

    itemsize = jnp.dtype(cos_theta.dtype).itemsize
    cost = pl.CostEstimate(
        flops=8 * B * C,
        transcendentals=B * C,
        bytes_accessed=B * C * itemsize + 3 * B * 4 + B * 4,
    )

    per_row = pl.pallas_call(
        functools.partial(_elastic_arcface_kernel, s=float(s), c_tile=ct),
        out_shape=jax.ShapeDtypeStruct((B, 1), jnp.float32),
        grid_spec=pltpu.PrefetchScalarGridSpec(
            num_scalar_prefetch=0,
            grid=(nb, nc),
            in_specs=[
                pl.BlockSpec((bt, ct), lambda i, j: (i, j)),   # cos_theta tile
                pl.BlockSpec((bt, 1), lambda i, j: (i, 0)),    # labels
                pl.BlockSpec((bt, 1), lambda i, j: (i, 0)),    # cos(margin)
                pl.BlockSpec((bt, 1), lambda i, j: (i, 0)),    # sin(margin)
            ],
            out_specs=pl.BlockSpec((bt, 1), lambda i, j: (i, 0)),
            scratch_shapes=[
                pltpu.VMEM((bt, 1), jnp.float32),   # running max
                pltpu.VMEM((bt, 1), jnp.float32),   # running sum-exp
                pltpu.VMEM((bt, 1), jnp.float32),   # target cosine
            ],
        ),
        compiler_params=pltpu.CompilerParams(
            dimension_semantics=("parallel", "arbitrary"),
            vmem_limit_bytes=32 * 1024 * 1024,
        ),
        cost_estimate=cost,
    )(cos_theta, lab, cos_m, sin_m)

    valid = (label != -1).astype(jnp.float32)
    cnt = jnp.maximum(jnp.sum(valid), 1.0)   # guard: all-ignore batch -> 0, not NaN
    return jnp.sum(per_row) / cnt


if __name__ == "__main__":
    key = jax.random.PRNGKey(0)
    k_x, k_lab, k_margin = jax.random.split(key, 3)

    # Small shapes consistent with the module; tiles chosen so the demo
    # exercises a real 2x2 grid (B-parallel, C-reduction).
    B, C = 16, 256
    cos_theta = jnp.tanh(jax.random.normal(k_x, (B, C), dtype=jnp.float32))
    label = jax.random.randint(k_lab, (B,), 0, C, dtype=jnp.int32)
    label = label.at[3].set(-1)   # exercise the ignore path

    loss = elastic_arcface_loss(cos_theta, label, k_margin, b_tile=8, c_tile=128)
    jax.block_until_ready(loss)

    # Pure-JAX reference (follows the PyTorch forward literally, same margin draw,
    # with -1 treated as ignore).
    margin = 0.5 + 0.0125 * jax.random.normal(k_margin, (B, 1), dtype=jnp.float32)
    ct_ref = jnp.clip(cos_theta, -1.0 + 1e-7, 1.0 - 1e-7)
    theta = jnp.arccos(ct_ref)
    valid = label != -1
    safe_lab = jnp.where(valid, label, 0)
    m_hot = jnp.zeros((B, C)).at[jnp.arange(B), safe_lab].set(
        jnp.where(valid, margin[:, 0], 0.0))
    logits_ref = jnp.cos(theta + m_hot) * 30.0
    lse = jax.scipy.special.logsumexp(logits_ref, axis=-1)
    per_row_ref = lse - logits_ref[jnp.arange(B), safe_lab]
    ref = jnp.sum(jnp.where(valid, per_row_ref, 0.0)) / jnp.maximum(
        jnp.sum(valid.astype(jnp.float32)), 1.0)

    assert jnp.allclose(loss, ref, atol=1e-3, rtol=1e-3), (loss, ref)
    print("KERNEL_OK")
</pallas_src>

<mosaic_0001>
module attributes {stable_mosaic.version = 11 : i64} {
  func.func @_elastic_arcface_kernel(%arg0: i32, %arg1: i32, %arg2: memref<8x128xf32, #tpu.memory_space<vmem>>, %arg3: memref<8x1xi32, #tpu.memory_space<vmem>>, %arg4: memref<8x1xf32, #tpu.memory_space<vmem>>, %arg5: memref<8x1xf32, #tpu.memory_space<vmem>>, %arg6: memref<8x1xf32, #tpu.memory_space<vmem>>, %arg7: memref<8x1xf32, #tpu.memory_space<vmem>>, %arg8: memref<8x1xf32, #tpu.memory_space<vmem>>, %arg9: memref<8x1xf32, #tpu.memory_space<vmem>>) attributes {dimension_semantics = [#tpu.dimension_semantics<parallel>, #tpu.dimension_semantics<arbitrary>], iteration_bounds = array<i64: 2, 2>, scalar_prefetch = 0 : i64, scratch_operands = 3 : i64, tpu.core_type = #tpu.core_type<tc>, window_params = [{transform_indices = @transform_0, window_bounds = array<i64: 8, 128>}, {transform_indices = @transform_1, window_bounds = array<i64: 8, 1>}, {transform_indices = @transform_2, window_bounds = array<i64: 8, 1>}, {transform_indices = @transform_3, window_bounds = array<i64: 8, 1>}, {transform_indices = @transform_4, window_bounds = array<i64: 8, 1>}]} {
    %c0_i32 = arith.constant 0 : i32
    %0 = arith.cmpi eq, %arg1, %c0_i32 : i32
    %1 = arith.extui %0 : i1 to i32
    %c0_i32_0 = arith.constant 0 : i32
    %2 = arith.cmpi ne, %1, %c0_i32_0 : i32
    scf.if %2 {
      %cst_25 = arith.constant 0xFF800000 : f32
      %44 = vector.broadcast %cst_25 : f32 to vector<8x1xf32>
      %c0_26 = arith.constant 0 : index
      %c0_27 = arith.constant 0 : index
      %45 = vector.load %arg7[%c0_26, %c0_27] : memref<8x1xf32, #tpu.memory_space<vmem>>, vector<8x1xf32>
      tpu.vector_store %arg7[%c0_26, %c0_27], %44 {strides = array<i32>} : memref<8x1xf32, #tpu.memory_space<vmem>>, vector<8x1xf32>,
      %cst_28 = arith.constant 0.000000e+00 : f32
      %46 = vector.broadcast %cst_28 : f32 to vector<8x1xf32>
      %c0_29 = arith.constant 0 : index
      %c0_30 = arith.constant 0 : index
      %47 = vector.load %arg8[%c0_29, %c0_30] : memref<8x1xf32, #tpu.memory_space<vmem>>, vector<8x1xf32>
      tpu.vector_store %arg8[%c0_29, %c0_30], %46 {strides = array<i32>} : memref<8x1xf32, #tpu.memory_space<vmem>>, vector<8x1xf32>,
      %cst_31 = arith.constant 0.000000e+00 : f32
      %48 = vector.broadcast %cst_31 : f32 to vector<8x1xf32>
      %c0_32 = arith.constant 0 : index
      %c0_33 = arith.constant 0 : index
      %49 = vector.load %arg9[%c0_32, %c0_33] : memref<8x1xf32, #tpu.memory_space<vmem>>, vector<8x1xf32>
      tpu.vector_store %arg9[%c0_32, %c0_33], %48 {strides = array<i32>} : memref<8x1xf32, #tpu.memory_space<vmem>>, vector<8x1xf32>,
    } else {
    }
    %c0 = arith.constant 0 : index
    %c0_1 = arith.constant 0 : index
    %3 = vector.load %arg2[%c0, %c0_1] : memref<8x128xf32, #tpu.memory_space<vmem>>, vector<8x128xf32>
    %cst = arith.constant -0.99999988 : f32
    %cst_2 = arith.constant 0.99999988 : f32
    %4 = vector.broadcast %cst : f32 to vector<8x128xf32>
    %5 = arith.maximumf %4, %3 : vector<8x128xf32>
    %6 = vector.broadcast %cst_2 : f32 to vector<8x128xf32>
    %7 = arith.minimumf %6, %5 : vector<8x128xf32>
    %cst_3 = arith.constant 3.000000e+01 : f32
    %8 = vector.broadcast %cst_3 : f32 to vector<8x128xf32>
    %9 = arith.mulf %7, %8 : vector<8x128xf32>
    %c0_4 = arith.constant 0 : index
    %c0_5 = arith.constant 0 : index
    %10 = vector.load %arg3[%c0_4, %c0_5] : memref<8x1xi32, #tpu.memory_space<vmem>>, vector<8x1xi32>
    %c128_i32 = arith.constant 128 : i32
    %11 = arith.muli %arg1, %c128_i32 : i32
    %12 = tpu.iota {dimensions = array<i32: 1>} : vector<8x128xi32>
    %13 = vector.broadcast %11 : i32 to vector<8x128xi32>
    %14 = arith.addi %13, %12 : vector<8x128xi32>
    %15 = vector.broadcast %10 : vector<8x1xi32> to vector<8x128xi32>
    %16 = arith.cmpi eq, %14, %15 : vector<8x128xi32>
    %c0_6 = arith.constant 0 : index
    %c0_7 = arith.constant 0 : index
    %17 = vector.load %arg9[%c0_6, %c0_7] : memref<8x1xf32, #tpu.memory_space<vmem>>, vector<8x1xf32>
    %cst_8 = arith.constant 0.000000e+00 : f32
    %18 = vector.broadcast %cst_8 : f32 to vector<8x128xf32>
    %19 = arith.select %16, %7, %18 : vector<8x128xi1>, vector<8x128xf32>
    %cst_9 = arith.constant dense<0.000000e+00> : vector<8xf32>
    %20 = vector.multi_reduction <add>, %19, %cst_9 [1] : vector<8x128xf32> to vector<8xf32>
    %21 = vector.shape_cast %20 : vector<8xf32> to vector<8x1xf32>
    %22 = arith.addf %17, %21 : vector<8x1xf32>
    %c0_10 = arith.constant 0 : index
    %c0_11 = arith.constant 0 : index
    %23 = vector.load %arg9[%c0_10, %c0_11] : memref<8x1xf32, #tpu.memory_space<vmem>>, vector<8x1xf32>
    tpu.vector_store %arg9[%c0_10, %c0_11], %22 {strides = array<i32>} : memref<8x1xf32, #tpu.memory_space<vmem>>, vector<8x1xf32>,
    %c0_12 = arith.constant 0 : index
    %c0_13 = arith.constant 0 : index
    %24 = vector.load %arg7[%c0_12, %c0_13] : memref<8x1xf32, #tpu.memory_space<vmem>>, vector<8x1xf32>
    %cst_14 = arith.constant dense<0xFF800000> : vector<8xf32>
    %25 = vector.multi_reduction <maximumf>, %9, %cst_14 [1] : vector<8x128xf32> to vector<8xf32>
    %26 = vector.shape_cast %25 : vector<8xf32> to vector<8x1xf32>
    %27 = arith.maximumf %24, %26 : vector<8x1xf32>
    %c0_15 = arith.constant 0 : index
    %c0_16 = arith.constant 0 : index
    %28 = vector.load %arg8[%c0_15, %c0_16] : memref<8x1xf32, #tpu.memory_space<vmem>>, vector<8x1xf32>
    %c0_17 = arith.constant 0 : index
    %c0_18 = arith.constant 0 : index
    %29 = vector.load %arg7[%c0_17, %c0_18] : memref<8x1xf32, #tpu.memory_space<vmem>>, vector<8x1xf32>
    %30 = arith.subf %29, %27 : vector<8x1xf32>
    %31 = math.exp %30 : vector<8x1xf32>
    %32 = arith.mulf %28, %31 : vector<8x1xf32>
    %33 = vector.broadcast %27 : vector<8x1xf32> to vector<8x128xf32>
    %34 = arith.subf %9, %33 : vector<8x128xf32>
    %35 = math.exp %34 : vector<8x128xf32>
    %cst_19 = arith.constant dense<0.000000e+00> : vector<8xf32>
    %36 = vector.multi_reduction <add>, %35, %cst_19 [1] : vector<8x128xf32> to vector<8xf32>
    %37 = vector.shape_cast %36 : vector<8xf32> to vector<8x1xf32>
    %38 = arith.addf %32, %37 : vector<8x1xf32>
    %c0_20 = arith.constant 0 : index
    %c0_21 = arith.constant 0 : index
    %39 = vector.load %arg8[%c0_20, %c0_21] : memref<8x1xf32, #tpu.memory_space<vmem>>, vector<8x1xf32>
    tpu.vector_store %arg8[%c0_20, %c0_21], %38 {strides = array<i32>} : memref<8x1xf32, #tpu.memory_space<vmem>>, vector<8x1xf32>,
    %c0_22 = arith.constant 0 : index
    %c0_23 = arith.constant 0 : index
    %40 = vector.load %arg7[%c0_22, %c0_23] : memref<8x1xf32, #tpu.memory_space<vmem>>, vector<8x1xf32>
    tpu.vector_store %arg7[%c0_22, %c0_23], %27 {strides = array<i32>} : memref<8x1xf32, #tpu.memory_space<vmem>>, vector<8x1xf32>,
    %c1_i32 = arith.constant 1 : i32
    %41 = arith.cmpi eq, %arg1, %c1_i32 : i32
    %42 = arith.extui %41 : i1 to i32
    %c0_i32_24 = arith.constant 0 : i32
    %43 = arith.cmpi ne, %42, %c0_i32_24 : i32
    scf.if %43 {
      %c-1_i32 = arith.constant -1 : i32
      %44 = vector.broadcast %c-1_i32 : i32 to vector<8x1xi32>
      %45 = arith.cmpi ne, %10, %44 : vector<8x1xi32>
      %c0_25 = arith.constant 0 : index
      %c0_26 = arith.constant 0 : index
      %46 = vector.load %arg9[%c0_25, %c0_26] : memref<8x1xf32, #tpu.memory_space<vmem>>, vector<8x1xf32>
      %c0_27 = arith.constant 0 : index
      %c0_28 = arith.constant 0 : index
      %47 = vector.load %arg4[%c0_27, %c0_28] : memref<8x1xf32, #tpu.memory_space<vmem>>, vector<8x1xf32>
      %c0_29 = arith.constant 0 : index
      %c0_30 = arith.constant 0 : index
      %48 = vector.load %arg5[%c0_29, %c0_30] : memref<8x1xf32, #tpu.memory_space<vmem>>, vector<8x1xf32>
      %49 = arith.mulf %46, %47 : vector<8x1xf32>
      %50 = arith.mulf %46, %46 : vector<8x1xf32>
      %cst_31 = arith.constant 1.000000e+00 : f32
      %51 = vector.broadcast %cst_31 : f32 to vector<8x1xf32>
      %52 = arith.subf %51, %50 : vector<8x1xf32>
      %cst_32 = arith.constant 0.000000e+00 : f32
      %53 = vector.broadcast %cst_32 : f32 to vector<8x1xf32>
      %54 = arith.maximumf %52, %53 : vector<8x1xf32>
      %55 = math.sqrt %54 : vector<8x1xf32>
      %56 = arith.mulf %55, %48 : vector<8x1xf32>
      %57 = arith.subf %49, %56 : vector<8x1xf32>
      %cst_33 = arith.constant 3.000000e+01 : f32
      %58 = vector.broadcast %cst_33 : f32 to vector<8x1xf32>
      %59 = arith.mulf %46, %58 : vector<8x1xf32>
      %cst_34 = arith.constant 3.000000e+01 : f32
      %60 = vector.broadcast %cst_34 : f32 to vector<8x1xf32>
      %61 = arith.mulf %57, %60 : vector<8x1xf32>
      %c0_35 = arith.constant 0 : index
      %c0_36 = arith.constant 0 : index
      %62 = vector.load %arg7[%c0_35, %c0_36] : memref<8x1xf32, #tpu.memory_space<vmem>>, vector<8x1xf32>
      %63 = arith.subf %61, %62 : vector<8x1xf32>
      %64 = math.exp %63 : vector<8x1xf32>
      %65 = arith.subf %59, %62 : vector<8x1xf32>
      %66 = math.exp %65 : vector<8x1xf32>
      %67 = arith.subf %64, %66 : vector<8x1xf32>
      %cst_37 = arith.constant 0.000000e+00 : f32
      %68 = vector.broadcast %cst_37 : f32 to vector<8x1xf32>
      %69 = arith.select %45, %67, %68 : vector<8x1xi1>, vector<8x1xf32>
      %c0_38 = arith.constant 0 : index
      %c0_39 = arith.constant 0 : index
      %70 = vector.load %arg8[%c0_38, %c0_39] : memref<8x1xf32, #tpu.memory_space<vmem>>, vector<8x1xf32>
      %71 = arith.addf %70, %69 : vector<8x1xf32>
      %72 = math.log %71 : vector<8x1xf32>
      %73 = arith.addf %62, %72 : vector<8x1xf32>
      %74 = arith.subf %73, %61 : vector<8x1xf32>
      %cst_40 = arith.constant 0.000000e+00 : f32
      %75 = vector.broadcast %cst_40 : f32 to vector<8x1xf32>
      %76 = arith.select %45, %74, %75 : vector<8x1xi1>, vector<8x1xf32>
      %c0_41 = arith.constant 0 : index
      %c0_42 = arith.constant 0 : index
      %77 = vector.load %arg6[%c0_41, %c0_42] : memref<8x1xf32, #tpu.memory_space<vmem>>, vector<8x1xf32>
      tpu.vector_store %arg6[%c0_41, %c0_42], %76 {strides = array<i32>} : memref<8x1xf32, #tpu.memory_space<vmem>>, vector<8x1xf32>,
    } else {
    }
    return
  }
  func.func @transform_0(%arg0: i32, %arg1: i32) -> (i32, i32) {
    %c0_i32 = arith.constant 0 : i32
    return %arg0, %arg1 : i32, i32
  }
  func.func @transform_1(%arg0: i32, %arg1: i32) -> (i32, i32) {
    %c0_i32 = arith.constant 0 : i32
    %c0_i32_0 = arith.constant 0 : i32
    return %arg0, %c0_i32 : i32, i32
  }
  func.func @transform_2(%arg0: i32, %arg1: i32) -> (i32, i32) {
    %c0_i32 = arith.constant 0 : i32
    %c0_i32_0 = arith.constant 0 : i32
    return %arg0, %c0_i32 : i32, i32
  }
  func.func @transform_3(%arg0: i32, %arg1: i32) -> (i32, i32) {
    %c0_i32 = arith.constant 0 : i32
    %c0_i32_0 = arith.constant 0 : i32
    return %arg0, %c0_i32 : i32, i32
  }
  func.func @transform_4(%arg0: i32, %arg1: i32) -> (i32, i32) {
    %c0_i32 = arith.constant 0 : i32
    %c0_i32_0 = arith.constant 0 : i32
    return %arg0, %c0_i32 : i32, i32
  }
}

</mosaic_0001>

<bundles_post_ra>
// kernel: tpu_custom_call.1
= control target key start
LH: loop header
LB: loop body
LE: loop exit
PB: predicated region body
PF: predicated region fallthrough
CT: control target
= control target key end

     0   :  { %s609_s15 = smov 0   ;;  %s611_s16 = smov 0   ;;  %s705_s0 = inlined_call_operand.vmem [shape: f32[16,256], index: 0, kind: input, shape index: {}]   ;;  %s706_s1 = inlined_call_operand.vmem [shape: s32[16,1], index: 1, kind: input, shape index: {}]   ;;  %s707_s2 = inlined_call_operand.vmem [shape: f32[16,1], index: 2, kind: input, shape index: {}]   ;;  %s708_s3 = inlined_call_operand.vmem [shape: f32[16,1], index: 3, kind: input, shape index: {}]   ;;  %s709_s4 = inlined_call_operand.vmem [shape: f32[16,1], index: 4, kind: output, shape index: {}]  }
   0x1   :  { %s613_s17 = smov 0   ;;  %s615_s18 = smov 0  }
   0x2   :  { %s617_s19 = smov 0  }
   0x3 LB: > { %s23_s20 = sadd.s32 1, %s571_s17  ;;  %s26_s21 = sadd.s32 1, %s575_s18  ;;  %s579_s19 = sphi %s617_s19, %s14_s19   ;;  %s575_s18 = sphi %s615_s18, %s713_s18   ;;  %s571_s17 = sphi %s613_s17, %s712_s17   ;;  %s567_s16 = sphi %s611_s16, %s711_s16   ;;  %s563_s15 = sphi %s609_s15, %s710_s15  }
   0x4   : > { %p24_p0 = scmp.ge.s32.totalorder %s23_s20, 2  ;;  %p471_p1 = scmp.ge.s32.totalorder %s579_s19, 1 }
   0x5   : > { %p206_p2 = scmp.lt.s32.totalorder %s579_s19, 5 }
   0x6   : > { %s715_s20 = smov (%p24_p0, %s23_s20), 0  ;;  %s717_s21 = smov (!%p24_p0, %s26_s21), %s575_s18 }
   0x7   : > { %p207_p3 = pnand %p471_p1, %p206_p2  ;;  %p28_p4 = scmp.ge.s32.totalorder %s717_s21, 2 }
   0x8   : > { %p246_p5 = scmp.lt.s32.totalorder (!%p207_p3), %s567_s16, 1  ;;  %p248_p6 = scmp.lt.s32.totalorder (!%p207_p3), %s563_s15, 1 }
   0x9   : > { %s719_s21 = smov (%p28_p4, %s717_s21), 0  ;;  %210 = sbr.rel (%p207_p3) target bundleno = 488 (0x1e8), region = 36 }
   0xa   : > { %p478_p7 = scmp.ne.s32.totalorder (!%p207_p3), %s563_s15, 0 }
  0x10   : > { %s721_s16 = smov (!%p246_p5, %s567_s16), 1  ;;  %273 = sbr.rel (%p478_p7) target bundleno = 23 (0x17), region = 40 }
  0x11   : > { %s249_s22 = scalar_select %p248_p6, %s563_s15, 1 }
  0x12   : > { %s472_s23 = sshll.u32 %s721_s16, 1  ;;  %s643_s24 = sshll.u32 %s721_s16, 3  ;;  %vm274_vm0 = vcmask (!%p478_p7), 7168   ;;  %v581_v0 = vmov (!%p478_p7), -inf   ;;  %v582_v1 = vmov (!%p478_p7), 0.0  }
  0x13   : > { %s251_s25 = sadd.s32 %s472_s23, %s249_s22  ;;  %s257_s28 = scalar_lea.vmem %s706_s1, %s643_s24  ;;  %275 = vst.msk [vmem:[#allocation2] sm:$0xff] (!%p478_p7), %vm274_vm0, %v581_v0  ;;  %276 = vst.msk [vmem:[#allocation3] sm:$0xff] (!%p478_p7), %vm274_vm0, %v582_v1 }
  0x14   : > { %s473_s29 = sshll.u32 %s251_s25, 3  ;;  %s261_s6 = scalar_lea.vmem %s707_s2, %s643_s24  ;;  %277 = vst.msk [vmem:[#allocation4] sm:$0xff] (!%p478_p7), %vm274_vm0, %v582_v1 }
  0x15   : > { %s253_s9 = scalar_lea.vmem %s705_s0, %s473_s29  ;;  %s265_s12 = scalar_lea.vmem %s708_s3, %s643_s24 }
  0x16   : > { %s269_s16 = scalar_lea.vmem %s709_s4, %s643_s24 }
  0x17 PF: > { %v278_v2 = vld [vmem:[%s253_s9] sm:$0xff]  ;;  %v583_v5 = vmov 0   ;;  %vm297_vm1 = vcmask 7168   ;;  %v284_v11 = vlaneseq  ;;  %s480_s22 = sshll.u32 %s563_s15, 7  ;;  %p481_p8 = scmp.ne.s32.totalorder %s563_s15, 1 }
  0x18   : > { %v479_v3 = vclamps-f32 %v278_v2, 0.9999999  ;;  %527 = vset.pattern.permute.xlu0 %v583_v5  ;;  %528 = vset.pattern.permute.xlu1 %v583_v5  ;;  %v665_v6 = vld [vmem:[%s257_s28] sm:$0xff]  ;;  %v286_v13 = vstv %s480_s22 }
  0x19   : > { %289 = vperm.xlu1 %528, %v665_v6   ;;  %v285_v12 = vand.u32 127, %v284_v11  ;;  %v327_v35 = vld [vmem:[%s261_s6] sm:$0xff] (!%p481_p8)  ;;  %vm325_vm5 = vcmp.ne.s32.totalorder (!%p481_p8), %v665_v6, 4294967295 }
  0x1a   : > { %v281_v4 = vmul.f32 30.0, %v479_v3  ;;  %v299_v7 = vld [vmem:[#allocation2] sm:$0xff]  ;;  %v303_v26 = vld [vmem:[#allocation3] sm:$0xff] }
  0x1b   : > { %v287_v15 = vadd.s32 %v286_v13, %v285_v12  ;;  %v292_v21 = vld [vmem:[#allocation4] sm:$0xff]  ;;  %v328_v39 = vld [vmem:[%s265_s12] sm:$0xff] (!%p481_p8) }
  0x1c   : > { %300 = vmax.xlane.f32.xlu0 %v281_v4 }
  0x98   : > { %v290_v14 = vpop.permute.xlu1 %289 }
  0x99   : > { %vm291_vm2 = vcmp.eq.s32.totalorder %v287_v15, %v290_v14 }
  0x9a   : > { %v293_v16 = vsel %vm291_vm2, %v479_v3, 0.0 }
  0x9b   : > { %294 = vadd.xlane.f32.xlu1 %v293_v16 }
  0xa9   : > { %v301_v8 = vpop.xlane.xlu0 %300 }
  0xaa   : > { %v302_v9 = vmax.f32 %v299_v7, %v301_v8 }
  0xac   : > { %v304_v10 = vsub.f32 %v299_v7, %v302_v9  ;;  %320 = vst.msk [vmem:[#allocation2] sm:$0xff] %vm297_vm1, %v302_v9  ;;  %310 = vperm.xlu0 %527, %v302_v9  }
  0xae   : > { %v305_v24 = vmul.f32 1.442695, %v304_v10 }
  0xb3   : > { %v344_v40 = vld [vmem:[#allocation2] sm:$0xff] (!%p481_p8) }
 0x128   : > { %v295_v22 = vpop.xlane.xlu1 %294 }
 0x129   : > { %v296_v23 = vadd.f32 %v295_v22, %v292_v21 }
 0x12b   : > { %v311_v17 = vpop.permute.xlu0 %310  ;;  %298 = vst.msk [vmem:[#allocation4] sm:$0xff] %vm297_vm1, %v296_v23 }
 0x12c   : > { %v313_v18 = vsub.f32 %v281_v4, %v311_v17 }
 0x12e   : > { %v314_v19 = vmul.f32 1.442695, %v313_v18 }
 0x130   : > { %529 = vpow2.f32 %v314_v19 }
 0x131   : > { %531 = vpow2.f32 %v305_v24 }
 0x132   : > { %v326_v30 = vld [vmem:[#allocation4] sm:$0xff] (!%p481_p8) }
 0x133   : > { %v330_v31 = vmul.f32 (!%p481_p8), %v326_v30, %v326_v30  ;;  %v342_v38 = vmul.f32 (!%p481_p8), 30.0, %v326_v30  ;;  %v329_v41 = vmul.f32 (!%p481_p8), %v327_v35, %v326_v30 }
 0x135   : > { %v331_v32 = vsub.f32 (!%p481_p8), 1.0, %v330_v31  ;;  %v348_v45 = vsub.f32 (!%p481_p8), %v342_v38, %v344_v40 }
 0x137   : > { %v332_v33 = vmax.f32 (!%p481_p8), %v331_v32, 0.0  ;;  %v349_v48 = vmul.f32 (!%p481_p8), 1.442695, %v348_v45 }
 0x139   : > { %533 = vrsqrt.f32 (!%p481_p8), %v332_v33  ;;  %vm335_vm3 = vcmp.eq.f32.partialorder (!%p481_p8), %v332_v33, inf  ;;  %v338_v36 = vand.u32 (!%p481_p8), 2147483648, %v332_v33  ;;  %vm337_vm4 = vcmp.eq.f32.partialorder (!%p481_p8), %v332_v33, 0.0 }
 0x13a   : > { %v530_v20 = vpop.eup %529  ;;  %535 = vpow2.f32 (!%p481_p8), %v349_v48 }
 0x13b   : > { %316 = vadd.xlane.f32.xlu1 %v530_v20  ;;  %v532_v25 = vpop.eup %531 }
 0x13c   : > { %v307_v27 = vmul.f32 %v532_v25, %v303_v26 }
 0x143   : > { %v534_v34 = vpop.eup (!%p481_p8), %533 }
 0x144   : > { %v334_v37 = vmul.f32 (!%p481_p8), %v534_v34, %v332_v33  ;;  %v536_v51 = vpop.eup (!%p481_p8), %535 }
 0x146   : > { %v336_v42 = vsel (!%p481_p8), %vm335_vm3, %v332_v33, %v334_v37 }
 0x147   : > { %v339_v43 = vsel (!%p481_p8), %vm337_vm4, %v338_v36, %v336_v42 }
 0x148   : > { %v340_v44 = vmul.f32 (!%p481_p8), %v339_v43, %v328_v39 }
 0x14a   : > { %v341_v46 = vsub.f32 (!%p481_p8), %v329_v41, %v340_v44 }
 0x14c   : > { %v343_v47 = vmul.f32 (!%p481_p8), 30.0, %v341_v46 }
 0x14e   : > { %v345_v49 = vsub.f32 (!%p481_p8), %v343_v47, %v344_v40 }
 0x150   : > { %v346_v50 = vmul.f32 (!%p481_p8), 1.442695, %v345_v49 }
 0x152   : > { %537 = vpow2.f32 (!%p481_p8), %v346_v50 }
 0x15c   : > { %v538_v52 = vpop.eup (!%p481_p8), %537 }
 0x15d   : > { %v351_v53 = vsub.f32 (!%p481_p8), %v538_v52, %v536_v51 }
 0x15f   : > { %v352_v55 = vsel (!%p481_p8), %vm325_vm5, %v351_v53, 0.0 }
 0x1c5   : > { %324 = sbr.rel (%p481_p8) target bundleno = 488 (0x1e8), region = 44 }
 0x1c8   : > { %v317_v28 = vpop.xlane.xlu1 %316 }
 0x1c9   : > { %v318_v29 = vadd.f32 %v317_v28, %v307_v27 }
 0x1cb   : > { %319 = vst.msk [vmem:[#allocation3] sm:$0xff] %vm297_vm1, %v318_v29 }
 0x1d2   : > { %v353_v54 = vld [vmem:[#allocation3] sm:$0xff] }
 0x1d3   : > { %v354_v56 = vadd.f32 %v353_v54, %v352_v55 }
 0x1d5   : > { %539 = vlog2.f32 %v354_v56 }
 0x1df   : > { %v540_v57 = vpop.eup %539 }
 0x1e0   : > { %v356_v58 = vmul.f32 0.6931472, %v540_v57 }
 0x1e2   : > { %v357_v59 = vadd.f32 %v356_v58, %v344_v40 }
 0x1e4   : > { %v358_v60 = vsub.f32 %v357_v59, %v343_v47 }
 0x1e6   : > { %v359_v61 = vsel %vm325_vm5, %v358_v60, 0.0 }
 0x1e7   : > { %360 = vst.msk [vmem:[%s269_s16] sm:$0xff] %vm297_vm1, %v359_v61 }
 0x1e8 PF: > { %s14_s19 = sadd.s32 1, %s579_s19   ;;  %s710_s15 = smov %s571_s17 }
 0x1e9   : > { %p11_p9 = scmp.ge.s32.totalorder %s14_s19, 6   ;;  %s711_s16 = smov %s575_s18 }
 0x1ea   : > { %s712_s17 = smov %s715_s20  ;;  %s713_s18 = smov %s719_s21 }
 0x1eb   :  { %13 = sbr.rel (!%p11_p9) target bundleno = 3 (0x3), region = 83 }

</bundles_post_ra>
